<compile_context>
chip_gen: v7x
topology: tpu7x:2x2x1
jax: 0.10.0
libtpu: 0.0.40
codegen_flags: <defaults>
</compile_context>

<pallas_src>
import jax
import jax.numpy as jnp
from jax.experimental import pallas as pl
from jax.experimental.pallas import tpu as pltpu


def _sigmoid(z):
    # tanh-based sigmoid: tanh goes to the EUP slot and is supported by Mosaic.
    return 0.5 * (jnp.tanh(0.5 * z) + 1.0)


def _elu(v):
    # ELU(alpha=1): v if v > 0 else exp(v) - 1.  (Unselected inf is harmless.)
    return jnp.where(v > 0.0, v, jnp.exp(v) - 1.0)


# ------------------------------ Pallas kernel ------------------------------ #
def _recurrent_model_kernel(x_ref, h_ref, wm_ref, bm_ref, wh_ref, wx_ref,
                            bg_ref, gamma_ref, beta_ref, o_ref):
    # x_ref: (bb, In)   h_ref: (bb, H)
    # wm_ref: (In, D)   bm_ref: (1, D)
    # wh_ref: (H, 3H)   wx_ref: (D, 3H)   bg_ref/gamma_ref/beta_ref: (1, 3H)
    # o_ref: (bb, H)
    x = x_ref[...]
    h = h_ref[...]

    # --- MLP: Linear + ELU ---
    feat = jnp.dot(x, wm_ref[...], preferred_element_type=jnp.float32) + bm_ref[...]
    feat = _elu(feat)

    # --- GRU linear on cat([h, feat], -1): weight pre-split -> two matmuls ---
    proj = (jnp.dot(h, wh_ref[...], preferred_element_type=jnp.float32)
            + jnp.dot(feat, wx_ref[...], preferred_element_type=jnp.float32)
            + bg_ref[...])

    # --- LayerNorm over the 3H gate dimension (eps = 1e-5, affine) ---
    mean = jnp.mean(proj, axis=-1, keepdims=True)
    cent = proj - mean
    var = jnp.mean(cent * cent, axis=-1, keepdims=True)
    normed = cent * jax.lax.rsqrt(var + 1e-5) * gamma_ref[...] + beta_ref[...]

    # --- GRU gates ---
    H = h.shape[-1]
    reset = _sigmoid(normed[:, :H])
    cand = jnp.tanh(reset * normed[:, H:2 * H])
    update = _sigmoid(normed[:, 2 * H:] - 1.0)
    o_ref[...] = update * cand + (1.0 - update) * h


def recurrent_forward(params, x, h, *, block_b=512):
    """Fused MLP + LayerNormGRUCell step. x: (B, In), h: (B, H) -> (B, H)."""
    w_mlp, b_mlp, w_h, w_x, b_gru, gamma, beta = params
    B, In = x.shape
    H = h.shape[-1]
    D = w_mlp.shape[1]

    # Full-batch block (always legal, no pad copy) unless B is large; then tile
    # with a multiple-of-8 block so the batch grid axis can be parallelized.
    if B <= block_b or (B % 8) != 0:
        bb = B
    else:
        bb = block_b
    grid = (pl.cdiv(B, bb),)

    def full(r, c):
        return pl.BlockSpec((r, c), lambda i: (0, 0))

    return pl.pallas_call(
        _recurrent_model_kernel,
        out_shape=jax.ShapeDtypeStruct((B, H), jnp.float32),
        grid=grid,
        in_specs=[
            pl.BlockSpec((bb, In), lambda i: (i, 0)),   # input
            pl.BlockSpec((bb, H), lambda i: (i, 0)),    # recurrent state
            full(In, D),                                # W_mlp
            full(1, D),                                 # b_mlp
            full(H, 3 * H),                             # W_gru (h part)
            full(D, 3 * H),                             # W_gru (feat part)
            full(1, 3 * H),                             # b_gru
            full(1, 3 * H),                             # LayerNorm gamma
            full(1, 3 * H),                             # LayerNorm beta
        ],
        out_specs=pl.BlockSpec((bb, H), lambda i: (i, 0)),
        compiler_params=pltpu.CompilerParams(dimension_semantics=("parallel",)),
    )(x, h, w_mlp, b_mlp, w_h, w_x, b_gru, gamma, beta)


# ------------------------------ Module wrapper ------------------------------ #
class RecurrentModelPallas:
    """Pallas-backed equivalent of sheeprl RecurrentModel (MLP layer_norm=False)."""

    def __init__(self, input_size, recurrent_state_size, dense_units, rng):
        self.input_size = input_size
        self.H = recurrent_state_size
        self.D = dense_units
        k1, k2, k3, k4 = jax.random.split(rng, 4)

        # MLP Linear(input_size -> dense_units), PyTorch default U(-1/sqrt(fan_in), ...),
        # stored pre-transposed as (In, D).
        b1 = 1.0 / (input_size ** 0.5)
        w_mlp = jax.random.uniform(k1, (input_size, dense_units), jnp.float32, -b1, b1)
        b_mlp = jax.random.uniform(k2, (1, dense_units), jnp.float32, -b1, b1)

        # GRU Linear(H + D -> 3H): stored pre-transposed (H+D, 3H) and pre-split into
        # the h-part (first H rows, matching cat([h, feat]) ordering) and feat-part.
        fan_in = recurrent_state_size + dense_units
        b2 = 1.0 / (fan_in ** 0.5)
        w_full = jax.random.uniform(k3, (fan_in, 3 * recurrent_state_size), jnp.float32, -b2, b2)
        w_h = w_full[:recurrent_state_size]
        w_x = w_full[recurrent_state_size:]
        b_gru = jax.random.uniform(k4, (1, 3 * recurrent_state_size), jnp.float32, -b2, b2)

        # LayerNorm(3H) affine params (PyTorch default init).
        gamma = jnp.ones((1, 3 * recurrent_state_size), jnp.float32)
        beta = jnp.zeros((1, 3 * recurrent_state_size), jnp.float32)

        self.params = (w_mlp, b_mlp, w_h, w_x, b_gru, gamma, beta)
        # TODO(synk): MLP layer_norm=True branch (LayerNorm after the MLP linear) not
        # implemented; the module default is layer_norm=False.

    def __call__(self, input, recurrent_state):
        # LayerNormGRUCell accepts a 3-D input/state with seq length 1 (batch_first=False).
        squeeze_seq = input.ndim == 3
        if squeeze_seq:
            assert input.shape[0] == 1, "sequence length must be 1"
            input = input[0]
        h = recurrent_state
        if h.ndim == 3:
            h = h[0]
        out = recurrent_forward(self.params, input, h)
        if squeeze_seq:
            out = out[None]
        return out


# ------------------------------ Pure-JAX check ------------------------------ #
def _reference_forward(params, x, h):
    w_mlp, b_mlp, w_h, w_x, b_gru, gamma, beta = params
    feat = _elu(x @ w_mlp + b_mlp)
    proj = h @ w_h + feat @ w_x + b_gru
    mean = proj.mean(-1, keepdims=True)
    cent = proj - mean
    var = (cent * cent).mean(-1, keepdims=True)
    normed = cent * jax.lax.rsqrt(var + 1e-5) * gamma + beta
    H = h.shape[-1]
    r = _sigmoid(normed[:, :H])
    c = jnp.tanh(r * normed[:, H:2 * H])
    u = _sigmoid(normed[:, 2 * H:] - 1.0)
    return u * c + (1.0 - u) * h


if __name__ == "__main__":
    key = jax.random.PRNGKey(0)
    k_params, k_x, k_h = jax.random.split(key, 3)

    # Small config consistent with the module: input = stochastic state + actions
    # concatenated.  H (recurrent_state_size) chosen as 128 for a lane-dense store.
    batch = 16
    input_size = 96
    dense_units = 128
    recurrent_state_size = 128

    model = RecurrentModelPallas(input_size, recurrent_state_size, dense_units, k_params)

    x = jax.random.normal(k_x, (batch, input_size), jnp.float32)
    h = jax.random.normal(k_h, (batch, recurrent_state_size), jnp.float32)

    out = jax.block_until_ready(model(x, h))
    assert out.shape == (batch, recurrent_state_size), out.shape

    ref = jax.block_until_ready(_reference_forward(model.params, x, h))
    assert jnp.allclose(out, ref, rtol=1e-3, atol=1e-3), float(jnp.max(jnp.abs(out - ref)))

    print("KERNEL_OK")
</pallas_src>

<mosaic_0001>
module attributes {stable_mosaic.version = 11 : i64} {
  func.func @_recurrent_model_kernel(%arg0: i32, %arg1: memref<16x96xf32, #tpu.memory_space<vmem>>, %arg2: memref<16x128xf32, #tpu.memory_space<vmem>>, %arg3: memref<96x128xf32, #tpu.memory_space<vmem>>, %arg4: memref<1x128xf32, #tpu.memory_space<vmem>>, %arg5: memref<128x384xf32, #tpu.memory_space<vmem>>, %arg6: memref<128x384xf32, #tpu.memory_space<vmem>>, %arg7: memref<1x384xf32, #tpu.memory_space<vmem>>, %arg8: memref<1x384xf32, #tpu.memory_space<vmem>>, %arg9: memref<1x384xf32, #tpu.memory_space<vmem>>, %arg10: memref<16x128xf32, #tpu.memory_space<vmem>>) attributes {dimension_semantics = [#tpu.dimension_semantics<parallel>], iteration_bounds = array<i64: 1>, scalar_prefetch = 0 : i64, scratch_operands = 0 : i64, tpu.core_type = #tpu.core_type<tc>, window_params = [{transform_indices = @transform_0, window_bounds = array<i64: 16, 96>}, {transform_indices = @transform_1, window_bounds = array<i64: 16, 128>}, {pipeline_mode = #tpu.pipeline_mode<synchronous>, transform_indices = @transform_2, window_bounds = array<i64: 96, 128>}, {pipeline_mode = #tpu.pipeline_mode<synchronous>, transform_indices = @transform_3, window_bounds = array<i64: 1, 128>}, {pipeline_mode = #tpu.pipeline_mode<synchronous>, transform_indices = @transform_4, window_bounds = array<i64: 128, 384>}, {pipeline_mode = #tpu.pipeline_mode<synchronous>, transform_indices = @transform_5, window_bounds = array<i64: 128, 384>}, {pipeline_mode = #tpu.pipeline_mode<synchronous>, transform_indices = @transform_6, window_bounds = array<i64: 1, 384>}, {pipeline_mode = #tpu.pipeline_mode<synchronous>, transform_indices = @transform_7, window_bounds = array<i64: 1, 384>}, {pipeline_mode = #tpu.pipeline_mode<synchronous>, transform_indices = @transform_8, window_bounds = array<i64: 1, 384>}, {transform_indices = @transform_9, window_bounds = array<i64: 16, 128>}]} {
    %c0 = arith.constant 0 : index
    %c0_0 = arith.constant 0 : index
    %0 = vector.load %arg1[%c0, %c0_0] : memref<16x96xf32, #tpu.memory_space<vmem>>, vector<16x96xf32>
    %c0_1 = arith.constant 0 : index
    %c0_2 = arith.constant 0 : index
    %1 = vector.load %arg2[%c0_1, %c0_2] : memref<16x128xf32, #tpu.memory_space<vmem>>, vector<16x128xf32>
    %c0_3 = arith.constant 0 : index
    %c0_4 = arith.constant 0 : index
    %2 = vector.load %arg3[%c0_3, %c0_4] : memref<96x128xf32, #tpu.memory_space<vmem>>, vector<96x128xf32>
    %cst = arith.constant dense<0.000000e+00> : vector<16x128xf32>
    %3 = tpu.matmul %0, %2, %cst {dimension_numbers = #tpu.dot_dimension_numbers<[1], [0], [0], [1], [0, 0, 1, 1], [], []>} : vector<16x96xf32>, vector<96x128xf32>, vector<16x128xf32> -> vector<16x128xf32>
    %c0_5 = arith.constant 0 : index
    %c0_6 = arith.constant 0 : index
    %4 = vector.load %arg4[%c0_5, %c0_6] : memref<1x128xf32, #tpu.memory_space<vmem>>, vector<1x128xf32>
    %5 = vector.broadcast %4 : vector<1x128xf32> to vector<16x128xf32>
    %6 = arith.addf %3, %5 : vector<16x128xf32>
    %cst_7 = arith.constant 0.000000e+00 : f32
    %7 = vector.broadcast %cst_7 : f32 to vector<16x128xf32>
    %8 = arith.cmpf ogt, %6, %7 : vector<16x128xf32>
    %9 = math.exp %6 : vector<16x128xf32>
    %cst_8 = arith.constant 1.000000e+00 : f32
    %10 = vector.broadcast %cst_8 : f32 to vector<16x128xf32>
    %11 = arith.subf %9, %10 : vector<16x128xf32>
    %12 = arith.select %8, %6, %11 : vector<16x128xi1>, vector<16x128xf32>
    %c0_9 = arith.constant 0 : index
    %c0_10 = arith.constant 0 : index
    %13 = vector.load %arg5[%c0_9, %c0_10] : memref<128x384xf32, #tpu.memory_space<vmem>>, vector<128x384xf32>
    %cst_11 = arith.constant dense<0.000000e+00> : vector<16x384xf32>
    %14 = tpu.matmul %1, %13, %cst_11 {dimension_numbers = #tpu.dot_dimension_numbers<[1], [0], [0], [1], [0, 0, 1, 1], [], []>} : vector<16x128xf32>, vector<128x384xf32>, vector<16x384xf32> -> vector<16x384xf32>
    %c0_12 = arith.constant 0 : index
    %c0_13 = arith.constant 0 : index
    %15 = vector.load %arg6[%c0_12, %c0_13] : memref<128x384xf32, #tpu.memory_space<vmem>>, vector<128x384xf32>
    %cst_14 = arith.constant dense<0.000000e+00> : vector<16x384xf32>
    %16 = tpu.matmul %12, %15, %cst_14 {dimension_numbers = #tpu.dot_dimension_numbers<[1], [0], [0], [1], [0, 0, 1, 1], [], []>} : vector<16x128xf32>, vector<128x384xf32>, vector<16x384xf32> -> vector<16x384xf32>
    %17 = arith.addf %14, %16 : vector<16x384xf32>
    %c0_15 = arith.constant 0 : index
    %c0_16 = arith.constant 0 : index
    %18 = vector.load %arg7[%c0_15, %c0_16] : memref<1x384xf32, #tpu.memory_space<vmem>>, vector<1x384xf32>
    %19 = vector.broadcast %18 : vector<1x384xf32> to vector<16x384xf32>
    %20 = arith.addf %17, %19 : vector<16x384xf32>
    %cst_17 = arith.constant dense<0.000000e+00> : vector<16xf32>
    %21 = vector.multi_reduction <add>, %20, %cst_17 [1] : vector<16x384xf32> to vector<16xf32>
    %22 = vector.shape_cast %21 : vector<16xf32> to vector<16x1xf32>
    %cst_18 = arith.constant 3.840000e+02 : f32
    %23 = vector.broadcast %cst_18 : f32 to vector<16x1xf32>
    %24 = arith.divf %22, %23 : vector<16x1xf32>
    %25 = vector.broadcast %24 : vector<16x1xf32> to vector<16x384xf32>
    %26 = arith.subf %20, %25 : vector<16x384xf32>
    %27 = arith.mulf %26, %26 : vector<16x384xf32>
    %cst_19 = arith.constant dense<0.000000e+00> : vector<16xf32>
    %28 = vector.multi_reduction <add>, %27, %cst_19 [1] : vector<16x384xf32> to vector<16xf32>
    %29 = vector.shape_cast %28 : vector<16xf32> to vector<16x1xf32>
    %cst_20 = arith.constant 3.840000e+02 : f32
    %30 = vector.broadcast %cst_20 : f32 to vector<16x1xf32>
    %31 = arith.divf %29, %30 : vector<16x1xf32>
    %cst_21 = arith.constant 9.99999974E-6 : f32
    %32 = vector.broadcast %cst_21 : f32 to vector<16x1xf32>
    %33 = arith.addf %31, %32 : vector<16x1xf32>
    %34 = math.rsqrt %33 : vector<16x1xf32>
    %35 = vector.broadcast %34 : vector<16x1xf32> to vector<16x384xf32>
    %36 = arith.mulf %26, %35 : vector<16x384xf32>
    %c0_22 = arith.constant 0 : index
    %c0_23 = arith.constant 0 : index
    %37 = vector.load %arg8[%c0_22, %c0_23] : memref<1x384xf32, #tpu.memory_space<vmem>>, vector<1x384xf32>
    %38 = vector.broadcast %37 : vector<1x384xf32> to vector<16x384xf32>
    %39 = arith.mulf %36, %38 : vector<16x384xf32>
    %c0_24 = arith.constant 0 : index
    %c0_25 = arith.constant 0 : index
    %40 = vector.load %arg9[%c0_24, %c0_25] : memref<1x384xf32, #tpu.memory_space<vmem>>, vector<1x384xf32>
    %41 = vector.broadcast %40 : vector<1x384xf32> to vector<16x384xf32>
    %42 = arith.addf %39, %41 : vector<16x384xf32>
    %43 = vector.extract_strided_slice %42 {offsets = [0, 0], sizes = [16, 128], strides = [1, 1]} : vector<16x384xf32> to vector<16x128xf32>
    %cst_26 = arith.constant 5.000000e-01 : f32
    %44 = vector.broadcast %cst_26 : f32 to vector<16x128xf32>
    %45 = arith.mulf %44, %43 : vector<16x128xf32>
    %46 = math.tanh %45 : vector<16x128xf32>
    %cst_27 = arith.constant 1.000000e+00 : f32
    %47 = vector.broadcast %cst_27 : f32 to vector<16x128xf32>
    %48 = arith.addf %46, %47 : vector<16x128xf32>
    %cst_28 = arith.constant 5.000000e-01 : f32
    %49 = vector.broadcast %cst_28 : f32 to vector<16x128xf32>
    %50 = arith.mulf %49, %48 : vector<16x128xf32>
    %51 = vector.extract_strided_slice %42 {offsets = [0, 128], sizes = [16, 128], strides = [1, 1]} : vector<16x384xf32> to vector<16x128xf32>
    %52 = arith.mulf %50, %51 : vector<16x128xf32>
    %53 = math.tanh %52 : vector<16x128xf32>
    %54 = vector.extract_strided_slice %42 {offsets = [0, 256], sizes = [16, 128], strides = [1, 1]} : vector<16x384xf32> to vector<16x128xf32>
    %cst_29 = arith.constant 1.000000e+00 : f32
    %55 = vector.broadcast %cst_29 : f32 to vector<16x128xf32>
    %56 = arith.subf %54, %55 : vector<16x128xf32>
    %cst_30 = arith.constant 5.000000e-01 : f32
    %57 = vector.broadcast %cst_30 : f32 to vector<16x128xf32>
    %58 = arith.mulf %57, %56 : vector<16x128xf32>
    %59 = math.tanh %58 : vector<16x128xf32>
    %cst_31 = arith.constant 1.000000e+00 : f32
    %60 = vector.broadcast %cst_31 : f32 to vector<16x128xf32>
    %61 = arith.addf %59, %60 : vector<16x128xf32>
    %cst_32 = arith.constant 5.000000e-01 : f32
    %62 = vector.broadcast %cst_32 : f32 to vector<16x128xf32>
    %63 = arith.mulf %62, %61 : vector<16x128xf32>
    %64 = arith.mulf %63, %53 : vector<16x128xf32>
    %cst_33 = arith.constant 1.000000e+00 : f32
    %65 = vector.broadcast %cst_33 : f32 to vector<16x128xf32>
    %66 = arith.subf %65, %63 : vector<16x128xf32>
    %67 = arith.mulf %66, %1 : vector<16x128xf32>
    %68 = arith.addf %64, %67 : vector<16x128xf32>
    %c0_34 = arith.constant 0 : index
    %c0_35 = arith.constant 0 : index
    %69 = vector.load %arg10[%c0_34, %c0_35] : memref<16x128xf32, #tpu.memory_space<vmem>>, vector<16x128xf32>
    tpu.vector_store %arg10[%c0_34, %c0_35], %68 {strides = array<i32>} : memref<16x128xf32, #tpu.memory_space<vmem>>, vector<16x128xf32>,
    return
  }
  func.func @transform_0(%arg0: i32) -> (i32, i32) {
    %c0_i32 = arith.constant 0 : i32
    %c0_i32_0 = arith.constant 0 : i32
    return %arg0, %c0_i32 : i32, i32
  }
  func.func @transform_1(%arg0: i32) -> (i32, i32) {
    %c0_i32 = arith.constant 0 : i32
    %c0_i32_0 = arith.constant 0 : i32
    return %arg0, %c0_i32 : i32, i32
  }
  func.func @transform_2(%arg0: i32) -> (i32, i32) {
    %c0_i32 = arith.constant 0 : i32
    %c0_i32_0 = arith.constant 0 : i32
    %c0_i32_1 = arith.constant 0 : i32
    return %c0_i32, %c0_i32_0 : i32, i32
  }
  func.func @transform_3(%arg0: i32) -> (i32, i32) {
    %c0_i32 = arith.constant 0 : i32
    %c0_i32_0 = arith.constant 0 : i32
    %c0_i32_1 = arith.constant 0 : i32
    return %c0_i32, %c0_i32_0 : i32, i32
  }
  func.func @transform_4(%arg0: i32) -> (i32, i32) {
    %c0_i32 = arith.constant 0 : i32
    %c0_i32_0 = arith.constant 0 : i32
    %c0_i32_1 = arith.constant 0 : i32
    return %c0_i32, %c0_i32_0 : i32, i32
  }
  func.func @transform_5(%arg0: i32) -> (i32, i32) {
    %c0_i32 = arith.constant 0 : i32
    %c0_i32_0 = arith.constant 0 : i32
    %c0_i32_1 = arith.constant 0 : i32
    return %c0_i32, %c0_i32_0 : i32, i32
  }
  func.func @transform_6(%arg0: i32) -> (i32, i32) {
    %c0_i32 = arith.constant 0 : i32
    %c0_i32_0 = arith.constant 0 : i32
    %c0_i32_1 = arith.constant 0 : i32
    return %c0_i32, %c0_i32_0 : i32, i32
  }
  func.func @transform_7(%arg0: i32) -> (i32, i32) {
    %c0_i32 = arith.constant 0 : i32
    %c0_i32_0 = arith.constant 0 : i32
    %c0_i32_1 = arith.constant 0 : i32
    return %c0_i32, %c0_i32_0 : i32, i32
  }
  func.func @transform_8(%arg0: i32) -> (i32, i32) {
    %c0_i32 = arith.constant 0 : i32
    %c0_i32_0 = arith.constant 0 : i32
    %c0_i32_1 = arith.constant 0 : i32
    return %c0_i32, %c0_i32_0 : i32, i32
  }
  func.func @transform_9(%arg0: i32) -> (i32, i32) {
    %c0_i32 = arith.constant 0 : i32
    %c0_i32_0 = arith.constant 0 : i32
    return %arg0, %c0_i32 : i32, i32
  }
}

</mosaic_0001>

<bundles_post_ra>
// kernel: tpu_custom_call.1
= control target key start
LH: loop header
LB: loop body
LE: loop exit
PB: predicated region body
PF: predicated region fallthrough
CT: control target
= control target key end

     0   :  { %14 = vsyncpa [#allocation3], 0  ;;  %s1460_s0 = inlined_call_operand.hbm [shape: f32[16,96], index: 0, kind: input, shape index: {}]   ;;  %s1461_s1 = inlined_call_operand.hbm [shape: f32[16,128], index: 1, kind: input, shape index: {}]   ;;  %s1462_s2 = inlined_call_operand.hbm [shape: f32[96,128], index: 2, kind: input, shape index: {}]   ;;  %s1463_s3 = inlined_call_operand.vmem [shape: f32[1,128], index: 3, kind: input, shape index: {}]   ;;  %s1464_s4 = inlined_call_operand.hbm [shape: f32[128,384], index: 4, kind: input, shape index: {}]   ;;  %s1465_s5 = inlined_call_operand.hbm [shape: f32[128,384], index: 5, kind: input, shape index: {}]   ;;  %s1466_s6 = inlined_call_operand.vmem [shape: f32[1,384], index: 6, kind: input, shape index: {}]   ;;  %s1467_s7 = inlined_call_operand.vmem [shape: f32[1,384], index: 7, kind: input, shape index: {}]   ;;  %s1468_s8 = inlined_call_operand.vmem [shape: f32[1,384], index: 8, kind: input, shape index: {}]   ;;  %s1469_s9 = inlined_call_operand.hbm [shape: f32[16,128], index: 9, kind: output, shape index: {}]  }
   0x1   :  { %15 = vsyncpa [#allocation6], 0 }
   0x2   :  { %16 = vsyncpa [#allocation9], 0 }
   0x3   :  { %17 = vsyncpa [#allocation4], 0  ;;  %s1262_s30 = smov [#allocation5]   ;;  %s1263_s11 = smov [#allocation8]  }
   0x4   :  { %s35_s10 = sshll.u32 %s1262_s30, 4  ;;  %s61_s12 = sshll.u32 %s1263_s11, 4  ;;  %s36_s10 = int_to_ptr.vmem [resolvable:$true] %s35_s10  ;;  %s1323_s12 = int_to_ptr.vmem [resolvable:$true] %s61_s12 }
   0x5   :  { %s1122_s15 = scalar_lea.hbm %s1461_s1, 256 }
   0x6   :  { %p1123_p0 = scmp.ne.s32.totalorder %s1461_s1, %s1122_s15  ;;  %p1126_p1 = scmp.lt.u32.totalorder %s1122_s15, %s1461_s1 }
   0x8   :  { %p1128_p2 = pnand %p1126_p1, %p1123_p0 }
   0xa   :  { %1131 = shalt.err (!%p1128_p2)
}
   0xb   :  { %s1132_s20 = scalar_lea.vmem %s36_s10, 256  ;;  %p1137_p4 = scmp.lt.s32.totalorder %s36_s10, %s36_s10 }
   0xc   :  { %p1133_p3 = scmp.ne.s32.totalorder %s36_s10, %s1132_s20  ;;  %p1138_p5 = scmp.lt.s32.totalorder %s1132_s20, %s1132_s20 }
   0xe   :  { %p1139_p6 = por %p1138_p5, %p1137_p4 }
  0x10   :  { %p1140_p7 = pnand %p1139_p6, %p1133_p3 }
  0x12   :  { %1143 = shalt.err (!%p1140_p7)
}
  0x13   :  { %s1264_s21 = smov 128   ;;  %s1265_s22 = smov 8  }
  0x14   :  { %41 = dma.hbm_to_vmem [thread:$0]  %s1461_s1, 256, %s36_s10, [#allocation6], %s1264_s21, %s1264_s21, %s1265_s22  }
  0x15   :  { %s1144_s27 = scalar_lea.hbm %s1464_s4, 6144 }
  0x16   :  { %p1145_p8 = scmp.ne.s32.totalorder %s1464_s4, %s1144_s27  ;;  %p1148_p9 = scmp.lt.u32.totalorder %s1144_s27, %s1464_s4 }
  0x18   :  { %p1150_p10 = pnand %p1148_p9, %p1145_p8 }
  0x1a   :  { %1153 = shalt.err (!%p1150_p10)
}
  0x1b   :  { %s1154_s13 = scalar_lea.vmem %s1323_s12, 6144  ;;  %p1159_p12 = scmp.lt.s32.totalorder %s1323_s12, %s1323_s12 }
  0x1c   :  { %p1155_p11 = scmp.ne.s32.totalorder %s1323_s12, %s1154_s13  ;;  %p1160_p13 = scmp.lt.s32.totalorder %s1154_s13, %s1154_s13 }
  0x1e   :  { %p1161_p0 = por %p1160_p13, %p1159_p12 }
  0x20   :  { %p1162_p1 = pnand %p1161_p0, %p1155_p11 }
  0x22   :  { %1165 = shalt.err (!%p1162_p1)
}
  0x23   :  { %s1266_s1 = smov 384   ;;  %s1267_s10 = smov 24  }
  0x24   :  { %67 = dma.hbm_to_vmem [thread:$0]  %s1464_s4, 6144, %s1323_s12, [#allocation9], %s1266_s1, %s1266_s1, %s1267_s10  }
  0x25   :  { %s1268_s16 = smov [#allocation2]   ;;  %s1269_s18 = smov [#allocation7]  }
  0x26   :  { %s23_s17 = sshll.u32 %s1268_s16, 4  ;;  %s47_s19 = sshll.u32 %s1269_s18, 4  ;;  %s24_s17 = int_to_ptr.vmem [resolvable:$true] %s23_s17  ;;  %s1360_s19 = int_to_ptr.vmem [resolvable:$true] %s47_s19 }
  0x27   :  { %s1166_s24 = scalar_lea.hbm %s1460_s0, 256 }
  0x28   :  { %p1167_p2 = scmp.ne.s32.totalorder %s1460_s0, %s1166_s24  ;;  %p1170_p3 = scmp.lt.u32.totalorder %s1166_s24, %s1460_s0 }
  0x2a   :  { %p1172_p4 = pnand %p1170_p3, %p1167_p2 }
  0x2c   :  { %1175 = shalt.err (!%p1172_p4)
}
  0x2d   :  { %s1176_s4 = scalar_lea.vmem %s24_s17, 256  ;;  %p1181_p6 = scmp.lt.s32.totalorder %s24_s17, %s24_s17 }
  0x2e   :  { %p1177_p5 = scmp.ne.s32.totalorder %s24_s17, %s1176_s4  ;;  %p1182_p7 = scmp.lt.s32.totalorder %s1176_s4, %s1176_s4 }
  0x30   :  { %p1183_p8 = por %p1182_p7, %p1181_p6 }
  0x32   :  { %p1184_p9 = pnand %p1183_p8, %p1177_p5 }
  0x34   :  { %1187 = shalt.err (!%p1184_p9)
}
  0x35   :  { %29 = dma.hbm_to_vmem [thread:$0]  %s1460_s0, 256, %s24_s17, [#allocation3], %s1264_s21, %s1264_s21, %s1265_s22  }
  0x36   :  { %s1188_s13 = scalar_lea.hbm %s1462_s2, 1536 }
  0x37   :  { %p1189_p10 = scmp.ne.s32.totalorder %s1462_s2, %s1188_s13  ;;  %p1192_p11 = scmp.lt.u32.totalorder %s1188_s13, %s1462_s2 }
  0x39   :  { %p1194_p12 = pnand %p1192_p11, %p1189_p10 }
  0x3b   :  { %1197 = shalt.err (!%p1194_p12)
}
  0x3c   :  { %s1198_s20 = scalar_lea.vmem %s1360_s19, 1536  ;;  %p1203_p0 = scmp.lt.s32.totalorder %s1360_s19, %s1360_s19 }
  0x3d   :  { %p1199_p13 = scmp.ne.s32.totalorder %s1360_s19, %s1198_s20  ;;  %p1204_p1 = scmp.lt.s32.totalorder %s1198_s20, %s1198_s20 }
  0x3f   :  { %p1205_p2 = por %p1204_p1, %p1203_p0 }
  0x41   :  { %p1206_p3 = pnand %p1205_p2, %p1199_p13 }
  0x43   :  { %1209 = shalt.err (!%p1206_p3)
}
  0x44   :  { %53 = dma.hbm_to_vmem [thread:$0]  %s1462_s2, 1536, %s1360_s19, [#allocation6], %s1264_s21, %s1264_s21, %s1265_s22  }
  0x45   :  { %s1270_s23 = smov [#allocation10]   ;;  %s1210_s27 = scalar_lea.hbm %s1465_s5, 6144 }
  0x46   :  { %s73_s24 = sshll.u32 %s1270_s23, 4  ;;  %p1211_p4 = scmp.ne.s32.totalorder %s1465_s5, %s1210_s27  ;;  %s74_s24 = int_to_ptr.vmem [resolvable:$true] %s73_s24 }
  0x47   :  { %p1214_p5 = scmp.lt.u32.totalorder %s1210_s27, %s1465_s5 }
  0x49   :  { %p1216_p6 = pnand %p1214_p5, %p1211_p4 }
  0x4b   :  { %1219 = shalt.err (!%p1216_p6)
}
  0x4c   :  { %s1220_s30 = scalar_lea.vmem %s74_s24, 6144  ;;  %p1225_p8 = scmp.lt.s32.totalorder %s74_s24, %s74_s24 }
  0x4d   :  { %p1221_p7 = scmp.ne.s32.totalorder %s74_s24, %s1220_s30  ;;  %p1226_p9 = scmp.lt.s32.totalorder %s1220_s30, %s1220_s30 }
  0x4f   :  { %p1227_p10 = por %p1226_p9, %p1225_p8 }
  0x51   :  { %p1228_p11 = pnand %p1227_p10, %p1221_p7 }
  0x53   :  { %1231 = shalt.err (!%p1228_p11)
}
  0x54   :  { %79 = dma.hbm_to_vmem [thread:$0]  %s1465_s5, 6144, %s74_s24, [#allocation9], %s1266_s1, %s1266_s1, %s1267_s10  }
  0x55   :  { %1254 = dma.done.wait [#allocation3], 256  }
  0x56   :  { %1255 = vsyncadd [#allocation3], 4294967040 }
  0x57   :  { %1256 = dma.done.wait [#allocation6], 1792  }
  0x58   :  { %1257 = vsyncadd [#allocation6], 4294965504 }
  0x59   :  { %1258 = dma.done.wait [#allocation9], 12288  }
  0x5a   :  { %1259 = vsyncadd [#allocation9], 4294955008  ;;  %v105_v0 = vld [vmem:[#allocation7] sm:$0xff]  ;;  %v106_v1 = vld [vmem:[#allocation7 + $0x8] sm:$0xff]  ;;  %vm124_vm0 = vcmask 785408  }
  0x5b   :  { %v107_v2 = vld [vmem:[#allocation7 + $0x10] sm:$0xff]  ;;  %v933_v3 = vpack.c.bf16 %v106_v1, %v105_v0  ;;  %v108_v4 = vld [vmem:[#allocation7 + $0x18] sm:$0xff]  ;;  %v109_v6 = vld [vmem:[#allocation7 + $0x20] sm:$0xff] }
  0x5c   :  { %v937_v5 = vpack.c.bf16 %v108_v4, %v107_v2  ;;  %v110_v7 = vld [vmem:[#allocation7 + $0x28] sm:$0xff]  ;;  %v101_v8 = vld [vmem:[#allocation2] sm:$0xff]  ;;  %v267_v13 = vld [vmem:[#allocation10 + $0x18] sm:$0xff] }
  0x5d   :  { %934 = vmatprep.subr.bf16.mxu0 %v933_v3  ;;  %v265_v9 = vld [vmem:[#allocation10 + $0x8] sm:$0xff]  ;;  %v941_v10 = vpack.c.bf16 %v110_v7, %v109_v6  ;;  %860 = vmatprep.mubr.msk.f32.mxu0 %vm124_vm0, %v101_v8  ;;  %v268_v11 = vld [vmem:[#allocation10 + $0x20] sm:$0xff]  ;;  %v111_v14 = vld [vmem:[#allocation7 + $0x30] sm:$0xff] }
  0x5e   :  { %936 = vmatpush3.bf16.msra.mxu0 %v933_v3  ;;  %v264_v12 = vld [vmem:[#allocation10] sm:$0xff]  ;;  %v112_v15 = vld [vmem:[#allocation7 + $0x38] sm:$0xff]  ;;  %v957_v16 = vpack.c.bf16 %v268_v11, %v265_v9  ;;  %v274_v19 = vld [vmem:[#allocation10 + $0x50] sm:$0xff] }
  0x5f   :  { %938 = vmatprep.subr.bf16.mxu0 %v937_v5  ;;  %v959_v17 = vpack.c.bf16 %v267_v13, %v264_v12  ;;  %v271_v18 = vld [vmem:[#allocation10 + $0x38] sm:$0xff]  ;;  %v270_v20 = vld [vmem:[#allocation10 + $0x30] sm:$0xff]  ;;  %v273_v21 = vld [vmem:[#allocation10 + $0x48] sm:$0xff]  ;;  %v945_v24 = vpack.c.bf16 %v112_v15, %v111_v14 }
  0x60   :  { %958 = vmatprep.subr.bf16.mxu1 %v957_v16  ;;  %v961_v22 = vpack.c.bf16 %v274_v19, %v271_v18  ;;  %v277_v23 = vld [vmem:[#allocation10 + $0x68] sm:$0xff]  ;;  %v113_v25 = vld [vmem:[#allocation7 + $0x40] sm:$0xff]  ;;  %v963_v26 = vpack.c.bf16 %v273_v21, %v270_v20  ;;  %v279_v31 = vld [vmem:[#allocation10 + $0x78] sm:$0xff]  ;;  %v1271_v16 = vmov 0.0  }
  0x61   :  { %960 = vmatpush1.bf16.msra.mxu1 %v959_v17  ;;  %v280_v27 = vld [vmem:[#allocation10 + $0x80] sm:$0xff]  ;;  %v114_v28 = vld [vmem:[#allocation7 + $0x48] sm:$0xff]  ;;  %v283_v32 = vld [vmem:[#allocation10 + $0x98] sm:$0xff]  ;;  %376 = vmatprep.mubr.f32.mxu1 %v1271_v16 }
  0x62   :  { %940 = vmatpush3.bf16.msra.mxu0 %v937_v5  ;;  %962 = vmatprep.subr.bf16.mxu1 %v961_v22  ;;  %v965_v29 = vpack.c.bf16 %v280_v27, %v277_v23  ;;  %v276_v30 = vld [vmem:[#allocation10 + $0x60] sm:$0xff]  ;;  %v286_v33 = vld [vmem:[#allocation10 + $0xb0] sm:$0xff]  ;;  %v949_v34 = vpack.c.bf16 %v114_v28, %v113_v25  ;;  %v116_v37 = vld [vmem:[#allocation7 + $0x58] sm:$0xff] }
  0x63   :  { %942 = vmatprep.subr.bf16.mxu0 %v941_v10  ;;  %v967_v35 = vpack.c.bf16 %v279_v31, %v276_v30  ;;  %v115_v36 = vld [vmem:[#allocation7 + $0x50] sm:$0xff]  ;;  %v969_v38 = vpack.c.bf16 %v286_v33, %v283_v32  ;;  %v269_v41 = vld [vmem:[#allocation10 + $0x28] sm:$0xff]  ;;  %v272_v43 = vld [vmem:[#allocation10 + $0x40] sm:$0xff] }
  0x64   :  { %v953_v39 = vpack.c.bf16 %v116_v37, %v115_v36  ;;  %v266_v40 = vld [vmem:[#allocation10 + $0x10] sm:$0xff]  ;;  %v275_v44 = vld [vmem:[#allocation10 + $0x58] sm:$0xff]  ;;  %v102_v45 = vld [vmem:[#allocation2 + $0x8] sm:$0xff] }
  0x65   :  { %964 = vmatpush1.bf16.msra.mxu1 %v963_v26  ;;  %v989_v42 = vpack.c.bf16 %v269_v41, %v266_v40  ;;  %v993_v46 = vpack.c.bf16 %v275_v44, %v272_v43  ;;  %v278_v47 = vld [vmem:[#allocation10 + $0x70] sm:$0xff]  ;;  %v281_v48 = vld [vmem:[#allocation10 + $0x88] sm:$0xff]  ;;  %v284_v52 = vld [vmem:[#allocation10 + $0xa0] sm:$0xff] }
  0x66   :  { %944 = vmatpush3.bf16.msra.mxu0 %v941_v10  ;;  %966 = vmatprep.subr.bf16.mxu1 %v965_v29  ;;  %v997_v49 = vpack.c.bf16 %v281_v48, %v278_v47  ;;  %v282_v50 = vld [vmem:[#allocation10 + $0x90] sm:$0xff]  ;;  %v285_v51 = vld [vmem:[#allocation10 + $0xa8] sm:$0xff]  ;;  %v287_v54 = vld [vmem:[#allocation10 + $0xb8] sm:$0xff] }
  0x67   :  { %946 = vmatprep.subr.bf16.mxu0 %v945_v24  ;;  %v971_v53 = vpack.c.bf16 %v285_v51, %v282_v50  ;;  %v1001_v55 = vpack.c.bf16 %v287_v54, %v284_v52  ;;  %v289_v56 = vld [vmem:[#allocation10 + $0xc8] sm:$0xff]  ;;  %v292_v57 = vld [vmem:[#allocation10 + $0xe0] sm:$0xff]  ;;  %v291_v60 = vld [vmem:[#allocation10 + $0xd8] sm:$0xff] }
  0x68   :  { %v973_v58 = vpack.c.bf16 %v292_v57, %v289_v56  ;;  %v288_v59 = vld [vmem:[#allocation10 + $0xc0] sm:$0xff]  ;;  %v290_v61 = vld [vmem:[#allocation10 + $0xd0] sm:$0xff]  ;;  %v293_v63 = vld [vmem:[#allocation10 + $0xe8] sm:$0xff] }
  0x69   :  { %968 = vmatpush1.bf16.msra.mxu1 %v967_v35  ;;  %v975_v62 = vpack.c.bf16 %v291_v60, %v288_v59  ;;  %v1005_v0 = vpack.c.bf16 %v293_v63, %v290_v61  ;;  %v295_v1 = vld [vmem:[#allocation10 + $0xf8] sm:$0xff]  ;;  %v298_v2 = vld [vmem:[#allocation10 + $0x110] sm:$0xff]  ;;  %v297_v5 = vld [vmem:[#allocation10 + $0x108] sm:$0xff] }
  0x6a   :  { %948 = vmatpush3.bf16.msra.mxu0 %v945_v24  ;;  %970 = vmatprep.subr.bf16.mxu1 %v969_v38  ;;  %v977_v3 = vpack.c.bf16 %v298_v2, %v295_v1  ;;  %v294_v4 = vld [vmem:[#allocation10 + $0xf0] sm:$0xff]  ;;  %v296_v6 = vld [vmem:[#allocation10 + $0x100] sm:$0xff]  ;;  %v299_v8 = vld [vmem:[#allocation10 + $0x118] sm:$0xff] }
  0x6b   :  { %950 = vmatprep.subr.bf16.mxu0 %v949_v34  ;;  %v979_v7 = vpack.c.bf16 %v297_v5, %v294_v4  ;;  %v301_v9 = vld [vmem:[#allocation10 + $0x128] sm:$0xff]  ;;  %v304_v10 = vld [vmem:[#allocation10 + $0x140] sm:$0xff]  ;;  %v1009_v11 = vpack.c.bf16 %v299_v8, %v296_v6  ;;  %v303_v14 = vld [vmem:[#allocation10 + $0x138] sm:$0xff] }
  0x6c   :  { %v981_v12 = vpack.c.bf16 %v304_v10, %v301_v9  ;;  %v300_v13 = vld [vmem:[#allocation10 + $0x120] sm:$0xff]  ;;  %v302_v15 = vld [vmem:[#allocation10 + $0x130] sm:$0xff]  ;;  %v305_v18 = vld [vmem:[#allocation10 + $0x148] sm:$0xff] }
  0x6d   :  { %972 = vmatpush1.bf16.msra.mxu1 %v971_v53  ;;  %v983_v17 = vpack.c.bf16 %v303_v14, %v300_v13  ;;  %v307_v19 = vld [vmem:[#allocation10 + $0x158] sm:$0xff]  ;;  %v310_v20 = vld [vmem:[#allocation10 + $0x170] sm:$0xff]  ;;  %v1013_v21 = vpack.c.bf16 %v305_v18, %v302_v15  ;;  %v309_v24 = vld [vmem:[#allocation10 + $0x168] sm:$0xff] }
  0x6e   :  { %952 = vmatpush3.bf16.msra.mxu0 %v949_v34  ;;  %974 = vmatprep.subr.bf16.mxu1 %v973_v58  ;;  %v985_v22 = vpack.c.bf16 %v310_v20, %v307_v19  ;;  %v306_v23 = vld [vmem:[#allocation10 + $0x150] sm:$0xff]  ;;  %v308_v25 = vld [vmem:[#allocation10 + $0x160] sm:$0xff]  ;;  %v311_v26 = vld [vmem:[#allocation10 + $0x178] sm:$0xff] }
  0x6f   :  { %954 = vmatprep.subr.bf16.mxu0 %v953_v39  ;;  %v217_v27 = vld [vmem:[#allocation8 + $0x8] sm:$0xff]  ;;  %v220_v28 = vld [vmem:[#allocation8 + $0x20] sm:$0xff]  ;;  %v1017_v29 = vpack.c.bf16 %v311_v26, %v308_v25  ;;  %v987_v30 = vpack.c.bf16 %v309_v24, %v306_v23  ;;  %v218_v32 = vld [vmem:[#allocation8 + $0x10] sm:$0xff] }
  0x70   :  { %v1021_v31 = vpack.c.bf16 %v220_v28, %v217_v27  ;;  %v221_v33 = vld [vmem:[#allocation8 + $0x28] sm:$0xff]  ;;  %v779_v35 = vld [vmem:[%s1463_s3] ss:$0 sm:$0xff]  ;;  %v219_v43 = vld [vmem:[#allocation8 + $0x18] sm:$0xff] }
  0x71   :  { %976 = vmatpush1.bf16.msra.mxu1 %v975_v62  ;;  %v1053_v34 = vpack.c.bf16 %v221_v33, %v218_v32  ;;  %v226_v48 = vld [vmem:[#allocation8 + $0x50] sm:$0xff]  ;;  %v227_v50 = vld [vmem:[#allocation8 + $0x58] sm:$0xff]  ;;  %v225_v54 = vld [vmem:[#allocation8 + $0x48] sm:$0xff] }
  0x72   :  { %956 = vmatpush3.bf16.msra.mxu0 %v953_v39  ;;  %978 = vmatprep.subr.bf16.mxu1 %v977_v3  ;;  %v222_v53 = vld [vmem:[#allocation8 + $0x30] sm:$0xff]  ;;  %v229_v58 = vld [vmem:[#allocation8 + $0x68] sm:$0xff]  ;;  %v232_v59 = vld [vmem:[#allocation8 + $0x80] sm:$0xff] }
  0x73   :  { %990 = vmatprep.subr.bf16.mxu0 %v989_v42  ;;  %v230_v61 = vld [vmem:[#allocation8 + $0x70] sm:$0xff]  ;;  %v233_v62 = vld [vmem:[#allocation8 + $0x88] sm:$0xff]  ;;  %v1027_v63 = vpack.c.bf16 %v225_v54, %v222_v53  ;;  %v1029_v1 = vpack.c.bf16 %v232_v59, %v229_v58  ;;  %v228_v2 = vld [vmem:[#allocation8 + $0x60] sm:$0xff]  ;;  %v618_v53 = vlaneseq }
  0x74   :  { %v231_v3 = vld [vmem:[#allocation8 + $0x78] sm:$0xff]  ;;  %v1061_v4 = vpack.c.bf16 %v233_v62, %v230_v61  ;;  %v238_v6 = vld [vmem:[#allocation8 + $0xb0] sm:$0xff]  ;;  %v241_v14 = vld [vmem:[#allocation8 + $0xc8] sm:$0xff] }
  0x75   :  { %861 = vmatmul.mubr.msk.f32.vlgmr.msra.gmra.mrb[0].mxu0 %vm124_vm0, %v102_v45  ;;  %980 = vmatpush1.bf16.msra.mxu1 %v979_v7  ;;  %v223_v45 = vld [vmem:[#allocation8 + $0x38] sm:$0xff]  ;;  %v236_v7 = vld [vmem:[#allocation8 + $0xa0] sm:$0xff]  ;;  %v1031_v9 = vpack.c.bf16 %v231_v3, %v228_v2  ;;  %v245_v18 = vld [vmem:[#allocation8 + $0xe8] sm:$0xff]  ;;  %v619_v54 = vshrl.u32 %v618_v53, 7 }
  0x76   :  { %992 = vmatpush3.bf16.msra.mxu0 %v989_v42  ;;  %982 = vmatprep.subr.bf16.mxu1 %v981_v12  ;;  %v216_v42 = vld [vmem:[#allocation8] sm:$0xff]  ;;  %v1025_v56 = vpack.c.bf16 %v226_v48, %v223_v45  ;;  %v235_v5 = vld [vmem:[#allocation8 + $0x98] sm:$0xff]  ;;  %v237_v12 = vld [vmem:[#allocation8 + $0xa8] sm:$0xff] }
  0x77   :  { %994 = vmatprep.subr.bf16.mxu0 %v993_v46  ;;  %v1023_v52 = vpack.c.bf16 %v219_v43, %v216_v42  ;;  %v239_v8 = vld [vmem:[#allocation8 + $0xb8] sm:$0xff]  ;;  %v1033_v10 = vpack.c.bf16 %v238_v6, %v235_v5  ;;  %v244_v15 = vld [vmem:[#allocation8 + $0xe0] sm:$0xff]  ;;  %v250_v25 = vld [vmem:[#allocation8 + $0x110] sm:$0xff]  ;;  %v628_v58 = vsub.s32 2, %v619_v54 }
  0x78   :  { %v1065_v13 = vpack.c.bf16 %v239_v8, %v236_v7  ;;  %v1037_v20 = vpack.c.bf16 %v244_v15, %v241_v14  ;;  %v247_v24 = vld [vmem:[#allocation8 + $0xf8] sm:$0xff]  ;;  %v248_v26 = vld [vmem:[#allocation8 + $0x100] sm:$0xff]  ;;  %v253_v33 = vld [vmem:[#allocation8 + $0x128] sm:$0xff] }
  0x79   :  { %984 = vmatpush1.bf16.msra.mxu1 %v983_v17  ;;  %v242_v17 = vld [vmem:[#allocation8 + $0xd0] sm:$0xff]  ;;  %v251_v27 = vld [vmem:[#allocation8 + $0x118] sm:$0xff] }
  0x7a   :  { %996 = vmatpush3.bf16.msra.mxu0 %v993_v46  ;;  %986 = vmatprep.subr.bf16.mxu1 %v985_v22  ;;  %v243_v22 = vld [vmem:[#allocation8 + $0xd8] sm:$0xff]  ;;  %v1069_v23 = vpack.c.bf16 %v245_v18, %v242_v17  ;;  %v1073_v32 = vpack.c.bf16 %v251_v27, %v248_v26  ;;  %v262_v43 = vld [vmem:[#allocation8 + $0x170] sm:$0xff] }
  0x7b   :  { %998 = vmatprep.subr.bf16.mxu0 %v997_v49  ;;  %v259_v42 = vld [vmem:[#allocation8 + $0x158] sm:$0xff]  ;;  %v258_v48 = vld [vmem:[#allocation8 + $0x150] sm:$0xff] }
  0x7c   :  { %v263_v45 = vld [vmem:[#allocation8 + $0x178] sm:$0xff] }
  0x7d   :  { %988 = vmatpush1.bf16.msra.mxu1 %v987_v30  ;;  %v246_v30 = vld [vmem:[#allocation8 + $0xf0] sm:$0xff] }
  0x7e   :  { %1000 = vmatpush3.bf16.msra.mxu0 %v997_v49  ;;  %1022 = vmatprep.subr.bf16.mxu1 %v1021_v31  ;;  %v224_v49 = vld [vmem:[#allocation8 + $0x40] sm:$0xff]  ;;  %v249_v31 = vld [vmem:[#allocation8 + $0x108] sm:$0xff] }
  0x7f   :  { %1002 = vmatprep.subr.bf16.mxu0 %v1001_v55  ;;  %v1057_v57 = vpack.c.bf16 %v227_v50, %v224_v49  ;;  %v261_v49 = vld [vmem:[#allocation8 + $0x168] sm:$0xff] }
  0x82   :  { %1004 = vmatpush3.bf16.msra.mxu0 %v1001_v55 }
  0x83   :  { %1006 = vmatprep.subr.bf16.mxu0 %v1005_v0 }
  0x86   :  { %1008 = vmatpush3.bf16.msra.mxu0 %v1005_v0  ;;  %v1418_v0 = vld [vmem:[#allocation5] sm:$0xff] }
  0x87   :  { %1010 = vmatprep.subr.bf16.mxu0 %v1009_v11 }
  0x8a   :  { %1012 = vmatpush3.bf16.msra.mxu0 %v1009_v11  ;;  %v234_v11 = vld [vmem:[#allocation8 + $0x90] sm:$0xff] }
  0x8b   :  { %1014 = vmatprep.subr.bf16.mxu0 %v1013_v21  ;;  %v1035_v19 = vpack.c.bf16 %v237_v12, %v234_v11 }
  0x8e   :  { %1016 = vmatpush3.bf16.msra.mxu0 %v1013_v21  ;;  %v240_v21 = vld [vmem:[#allocation8 + $0xc0] sm:$0xff] }
  0x8f   :  { %1018 = vmatprep.subr.bf16.mxu0 %v1017_v29  ;;  %v1039_v28 = vpack.c.bf16 %v243_v22, %v240_v21 }
  0x92   :  { %1020 = vmatpush3.bf16.msra.mxu0 %v1017_v29  ;;  %v1041_v29 = vpack.c.bf16 %v250_v25, %v247_v24 }
  0x93   :  { %1054 = vmatprep.subr.bf16.mxu0 %v1053_v34 }
 0x148   :  { %v862_v36 = vpop.f32.mrb[0].mxu0 }
 0x149   :  { %v203_v37 = vadd.f32 %v862_v36, %v779_v35  ;;  %v197_v38 = vpop.f32.mrb[1].mxu0  ;;  %v257_v36 = vld [vmem:[#allocation8 + $0x148] sm:$0xff] }
 0x14a   :  { %v198_v39 = vadd.f32 %v779_v35, %v197_v38  ;;  %v254_v35 = vld [vmem:[#allocation8 + $0x130] sm:$0xff] }
 0x14b   :  { %v210_v40 = vmul.f32 1.442695, %v203_v37  ;;  %vm207_vm2 = vcmp.gt.f32.partialorder %v203_v37, 0.0 }
 0x14c   :  { %v208_v41 = vmul.f32 1.442695, %v198_v39  ;;  %vm206_vm1 = vcmp.gt.f32.partialorder %v198_v39, 0.0 }
 0x14d   :  { %1102 = vpow2.f32 %v210_v40  ;;  %v255_v40 = vld [vmem:[#allocation8 + $0x138] sm:$0xff] }
 0x14e   :  { %1104 = vpow2.f32 %v208_v41  ;;  %v1077_v41 = vpack.c.bf16 %v257_v36, %v254_v35 }
 0x157   :  { %v1103_v44 = vpop.eup %1102 }
 0x158   :  { %v1105_v46 = vpop.eup %1104  ;;  %v783_v47 = vadd.f32 -1.0, %v1103_v44  ;;  %v260_v44 = vld [vmem:[#allocation8 + $0x160] sm:$0xff] }
 0x159   :  { %v782_v51 = vadd.f32 -1.0, %v1105_v46  ;;  %v1081_v50 = vpack.c.bf16 %v263_v45, %v260_v44 }
 0x15a   :  { %v215_v60 = vsel %vm207_vm2, %v203_v37, %v783_v47  ;;  %v1043_v37 = vpack.c.bf16 %v249_v31, %v246_v30  ;;  %v1049_v47 = vpack.c.bf16 %v262_v43, %v259_v42  ;;  %v705_v42 = vld [vmem:[%s1468_s8] sm:$0x7] }
 0x15b   :  { %v214_v55 = vsel %vm206_vm1, %v198_v39, %v782_v51  ;;  %v252_v39 = vld [vmem:[#allocation8 + $0x120] sm:$0xff]  ;;  %v1051_v51 = vpack.c.bf16 %v261_v49, %v258_v48  ;;  %v718_v49 = vrot.slane %v705_v42, %v628_v58 }
 0x15c   :  { %377 = vmatmul.mubr.f32.vlgmr.msra.gmra.mrb[0].mxu1 %v214_v55  ;;  %895 = vmatprep.mubr.f32.mxu0 %v214_v55  ;;  %v1047_v46 = vpack.c.bf16 %v255_v40, %v252_v39  ;;  %v620_v55 = vsub.s32 0, %v619_v54 }
 0x15d   :  { %1024 = vmatpush1.bf16.msra.mxu1 %v1023_v52  ;;  %896 = vmatmul.mubr.f32.vlgmr.msra.gmra.mrb[2].mxu0 %v215_v60  ;;  %v1423_v52 = vld [vmem:[#allocation5 + $0x8] sm:$0xff] }
 0x15e   :  { %1056 = vmatpush3.bf16.msra.mxu0 %v1053_v34  ;;  %382 = vmatprep.mubr.f32.mxu1 %v1271_v16  ;;  %v256_v34 = vld [vmem:[#allocation8 + $0x140] sm:$0xff] }
 0x15f   :  { %1026 = vmatprep.subr.bf16.mxu1 %v1025_v56  ;;  %1058 = vmatprep.subr.bf16.mxu0 %v1057_v57  ;;  %v1045_v38 = vpack.c.bf16 %v256_v34, %v253_v33  ;;  %v616_v56 = vld [vmem:[%s1466_s6] sm:$0x7] }
 0x160   :  { %383 = vmatmul.mubr.f32.gmra.mrb[2].mxu1 %v215_v60  ;;  %930 = vmatprep.mubr.f32.mxu0 %v1418_v0  ;;  %v621_v59 = vrot.slane %v616_v56, %v620_v55  ;;  %v629_v61 = vrot.slane %v616_v56, %v628_v58 }
 0x161   :  { %1028 = vmatpush1.bf16.msra.mxu1 %v1027_v63  ;;  %528 = vmatprep.mubr.f32.mxu1 %v1271_v16 }
 0x162   :  { %1060 = vmatpush3.bf16.msra.mxu0 %v1057_v57  ;;  %1030 = vmatprep.subr.bf16.mxu1 %v1029_v1  ;;  %v1432_v57 = vsub.s32 1, %v619_v54 }
 0x163   :  { %1062 = vmatprep.subr.bf16.mxu0 %v1061_v4 }
 0x164   :  { %v625_v60 = vrot.slane %v616_v56, %v1432_v57 }
 0x165   :  { %1032 = vmatpush1.bf16.msra.mxu1 %v1031_v9 }
 0x166   :  { %1064 = vmatpush3.bf16.msra.mxu0 %v1061_v4  ;;  %1034 = vmatprep.subr.bf16.mxu1 %v1033_v10 }
 0x167   :  { %1066 = vmatprep.subr.bf16.mxu0 %v1065_v13 }
 0x169   :  { %1036 = vmatpush1.bf16.msra.mxu1 %v1035_v19 }
 0x16a   :  { %1068 = vmatpush3.bf16.msra.mxu0 %v1065_v13  ;;  %1038 = vmatprep.subr.bf16.mxu1 %v1037_v20 }
 0x16b   :  { %1070 = vmatprep.subr.bf16.mxu0 %v1069_v23 }
 0x16d   :  { %1040 = vmatpush1.bf16.msra.mxu1 %v1039_v28 }
 0x16e   :  { %1072 = vmatpush3.bf16.msra.mxu0 %v1069_v23  ;;  %1042 = vmatprep.subr.bf16.mxu1 %v1041_v29 }
 0x16f   :  { %1074 = vmatprep.subr.bf16.mxu0 %v1073_v32 }
 0x171   :  { %1044 = vmatpush1.bf16.msra.mxu1 %v1043_v37 }
 0x172   :  { %1076 = vmatpush3.bf16.msra.mxu0 %v1073_v32  ;;  %1046 = vmatprep.subr.bf16.mxu1 %v1045_v38 }
 0x173   :  { %1078 = vmatprep.subr.bf16.mxu0 %v1077_v41 }
 0x175   :  { %1048 = vmatpush1.bf16.msra.mxu1 %v1047_v46  ;;  %v710_v46 = vrot.slane %v705_v42, %v620_v55 }
 0x176   :  { %1080 = vmatpush3.bf16.msra.mxu0 %v1077_v41  ;;  %1050 = vmatprep.subr.bf16.mxu1 %v1049_v47  ;;  %v682_v41 = vld [vmem:[%s1467_s7] sm:$0x7]  ;;  %s1272_s7 = smov [#allocation11]  }
 0x177   :  { %1082 = vmatprep.subr.bf16.mxu0 %v1081_v50  ;;  %v687_v43 = vrot.slane %v682_v41, %v620_v55  ;;  %v695_v44 = vrot.slane %v682_v41, %v628_v58  ;;  %s765_s8 = sshll.u32 %s1272_s7, 4  ;;  %s766_s8 = int_to_ptr.vmem [resolvable:$true] %s765_s8 }
 0x178   :  { %s1232_s15 = scalar_lea.vmem %s766_s8, 256  ;;  %p1237_p13 = scmp.lt.s32.totalorder %s766_s8, %s766_s8 }
 0x179   :  { %1052 = vmatpush1.bf16.msra.mxu1 %v1051_v51  ;;  %p1233_p12 = scmp.ne.s32.totalorder %s766_s8, %s1232_s15  ;;  %p1238_p0 = scmp.lt.s32.totalorder %s1232_s15, %s1232_s15 }
 0x17a   :  { %1084 = vmatpush3.bf16.msra.mxu0 %v1081_v50 }
 0x17b   :  { %p1239_p1 = por %p1238_p0, %p1237_p13 }
 0x17c   :  { %529 = vmatmul.mubr.f32.vlgmr.msra.gmra.mrb[0].mxu1 %v1418_v0 }
 0x17d   :  { %931 = vmatmul.mubr.f32.vlgmr.msra.gmra.mrb[2].mxu0 %v1423_v52  ;;  %534 = vmatprep.mubr.f32.mxu1 %v1271_v16  ;;  %p1240_p2 = pnand %p1239_p1, %p1233_p12 }
 0x180   :  { %535 = vmatmul.mubr.f32.gmra.mrb[2].mxu1 %v1423_v52 }
 0x24f   :  { %v530_v62 = vpop.f32.mrb[0].mxu1 }
 0x250   :  { %v633_v63 = vadd.f32 %v621_v59, %v530_v62  ;;  %v532_v1 = vpop.f32.mrb[1].mxu1  ;;  %v932_v16 = vpop.f32.mrb[2].mxu0 }
 0x251   :  { %v634_v2 = vadd.f32 %v625_v60, %v532_v1  ;;  %v607_v3 = vpop.f32.mrb[3].mxu0  ;;  %v638_v11 = vadd.f32 %v932_v16, %v629_v61 }
 0x252   :  { %v635_v4 = vadd.f32 %v629_v61, %v607_v3 }
 0x253   :  { %v536_v5 = vpop.f32.mrb[2].mxu1  ;;  %v639_v6 = vadd.f32 %v634_v2, %v633_v63 }
 0x254   :  { %v636_v7 = vadd.f32 %v621_v59, %v536_v5  ;;  %v538_v8 = vpop.f32.mrb[3].mxu1  ;;  %v691_v5 = vrot.slane %v682_v41, %v1432_v57 }
 0x255   :  { %v637_v9 = vadd.f32 %v625_v60, %v538_v8  ;;  %v640_v10 = vadd.f32 %v639_v6, %v635_v4 }
 0x257   :  { %v643_v12 = vadd.f32 %v637_v9, %v636_v7  ;;  %641 = vadd.xlane.f32.xlu0 %v640_v10 }
 0x259   :  { %v644_v13 = vadd.f32 %v643_v12, %v638_v11 }
 0x25b   :  { %645 = vadd.xlane.f32.xlu0 %v644_v13 }
 0x2e4   :  { %v642_v14 = vpop.xlane.xlu0 %641 }
 0x2e5   :  { %v648_v15 = vmul.f32 0.0026041667, %v642_v14 }
 0x2e7   :  { %v650_v17 = vsub.f32 %v633_v63, %v648_v15  ;;  %v651_v18 = vsub.f32 %v634_v2, %v648_v15  ;;  %v652_v19 = vsub.f32 %v635_v4, %v648_v15 }
 0x2e8   :  { %v646_v20 = vpop.xlane.xlu0 %645 }
 0x2e9   :  { %v649_v21 = vmul.f32 0.0026041667, %v646_v20  ;;  %v656_v22 = vmul.f32 %v650_v17, %v650_v17  ;;  %v657_v23 = vmul.f32 %v651_v18, %v651_v18  ;;  %v658_v24 = vmul.f32 %v652_v19, %v652_v19 }
 0x2eb   :  { %v653_v25 = vsub.f32 %v636_v7, %v649_v21  ;;  %v654_v26 = vsub.f32 %v637_v9, %v649_v21  ;;  %v655_v27 = vsub.f32 %v638_v11, %v649_v21  ;;  %v662_v28 = vadd.f32 %v657_v23, %v656_v22 }
 0x2ec   :  { %v714_v7 = vrot.slane %v705_v42, %v1432_v57 }
 0x2ed   :  { %v663_v29 = vadd.f32 %v662_v28, %v658_v24  ;;  %v659_v30 = vmul.f32 %v653_v25, %v653_v25  ;;  %v660_v31 = vmul.f32 %v654_v26, %v654_v26  ;;  %v661_v32 = vmul.f32 %v655_v27, %v655_v27 }
 0x2ef   :  { %664 = vadd.xlane.f32.xlu1 %v663_v29  ;;  %v666_v33 = vadd.f32 %v660_v31, %v659_v30 }
 0x2f1   :  { %v667_v34 = vadd.f32 %v666_v33, %v661_v32 }
 0x2f3   :  { %668 = vadd.xlane.f32.xlu1 %v667_v34 }
 0x37c   :  { %v665_v35 = vpop.xlane.xlu1 %664 }
 0x37d   :  { %v670_v36 = vmul.f32 0.0026041667, %v665_v35 }
 0x37f   :  { %v672_v37 = vadd.f32 1e-05, %v670_v36 }
 0x380   :  { %v669_v38 = vpop.xlane.xlu1 %668 }
 0x381   :  { %1106 = vrsqrt.f32 %v672_v37  ;;  %v671_v39 = vmul.f32 0.0026041667, %v669_v38 }
 0x383   :  { %v673_v40 = vadd.f32 1e-05, %v671_v39 }
 0x385   :  { %1108 = vrsqrt.f32 %v673_v40 }
 0x38b   :  { %v1107_v45 = vpop.eup %1106 }
 0x38c   :  { %v676_v47 = vmul.f32 %v1107_v45, %v650_v17  ;;  %v678_v48 = vmul.f32 %v1107_v45, %v652_v19  ;;  %v677_v6 = vmul.f32 %v1107_v45, %v651_v18 }
 0x38e   :  { %v699_v50 = vmul.f32 %v687_v43, %v676_v47  ;;  %v701_v51 = vmul.f32 %v695_v44, %v678_v48  ;;  %v700_v9 = vmul.f32 %v691_v5, %v677_v6 }
 0x38f   :  { %v1109_v53 = vpop.eup %1108 }
 0x390   :  { %v679_v54 = vmul.f32 %v1109_v53, %v653_v25  ;;  %v681_v56 = vmul.f32 %v1109_v53, %v655_v27  ;;  %v722_v59 = vadd.f32 %v710_v46, %v699_v50  ;;  %v724_v60 = vadd.f32 %v718_v49, %v701_v51 }
 0x391   :  { %v680_v8 = vmul.f32 %v1109_v53, %v654_v26  ;;  %v723_v14 = vadd.f32 %v714_v7, %v700_v9 }
 0x392   :  { %v702_v61 = vmul.f32 %v687_v43, %v679_v54  ;;  %v704_v62 = vmul.f32 %v695_v44, %v681_v56  ;;  %v728_v63 = vmul.f32 0.5, %v722_v59  ;;  %v784_v1 = vadd.f32 -1.0, %v724_v60 }
 0x393   :  { %v703_v13 = vmul.f32 %v691_v5, %v680_v8 }
 0x394   :  { %v725_v16 = vadd.f32 %v710_v46, %v702_v61  ;;  %v727_v2 = vadd.f32 %v718_v49, %v704_v62  ;;  %1110 = vtanh.f32 %v728_v63  ;;  %v742_v3 = vmul.f32 0.5, %v784_v1 }
 0x395   :  { %v726_v23 = vadd.f32 %v714_v7, %v703_v13 }
 0x396   :  { %v729_v4 = vmul.f32 0.5, %v725_v16  ;;  %v785_v55 = vadd.f32 -1.0, %v727_v2  ;;  %1112 = vtanh.f32 %v742_v3 }
 0x398   :  { %1114 = vtanh.f32 %v729_v4  ;;  %v743_v58 = vmul.f32 0.5, %v785_v55 }
 0x39a   :  { %1116 = vtanh.f32 %v743_v58 }
 0x39e   :  { %v1111_v10 = vpop.eup %1110 }
 0x39f   :  { %v732_v11 = vadd.f32 1.0, %v1111_v10 }
 0x3a0   :  { %v1113_v12 = vpop.eup %1112 }
 0x3a1   :  { %v734_v15 = vmul.f32 0.5, %v732_v11  ;;  %v746_v21 = vadd.f32 1.0, %v1113_v12 }
 0x3a2   :  { %v1115_v17 = vpop.eup %1114 }
 0x3a3   :  { %v733_v19 = vadd.f32 1.0, %v1115_v17  ;;  %v736_v20 = vmul.f32 %v734_v15, %v723_v14  ;;  %v748_v27 = vmul.f32 0.5, %v746_v21 }
 0x3a4   :  { %v1117_v22 = vpop.eup %1116 }
 0x3a5   :  { %v735_v24 = vmul.f32 0.5, %v733_v19  ;;  %1118 = vtanh.f32 %v736_v20  ;;  %v747_v25 = vadd.f32 1.0, %v1117_v22  ;;  %v752_v26 = vsub.f32 1.0, %v748_v27 }
 0x3a7   :  { %v737_v18 = vmul.f32 %v735_v24, %v726_v23  ;;  %v749_v57 = vmul.f32 0.5, %v747_v25  ;;  %v754_v31 = vmul.f32 %v752_v26, %v1418_v0 }
 0x3a9   :  { %1120 = vtanh.f32 %v737_v18  ;;  %v753_v30 = vsub.f32 1.0, %v749_v57 }
 0x3ab   :  { %v755_v35 = vmul.f32 %v753_v30, %v1423_v52 }
 0x3af   :  { %v1119_v28 = vpop.eup %1118 }
 0x3b0   :  { %v750_v29 = vmul.f32 %v1119_v28, %v748_v27 }
 0x3b2   :  { %v756_v32 = vadd.f32 %v754_v31, %v750_v29 }
 0x3b3   :  { %v1121_v33 = vpop.eup %1120 }
 0x3b4   :  { %v751_v34 = vmul.f32 %v1121_v33, %v749_v57  ;;  %758 = vst [vmem:[#allocation11] sm:$0xff] %v756_v32 }
 0x3b6   :  { %v757_v36 = vadd.f32 %v755_v35, %v751_v34 }
 0x3b8   :  { %759 = vst [vmem:[#allocation11 + $0x8] sm:$0xff] %v757_v36 }
 0x3b9   :  { %1243 = shalt.err (!%p1240_p2)
}
 0x3ba   :  { %s1244_s20 = scalar_lea.hbm %s1469_s9, 256 }
 0x3bb   :  { %p1245_p3 = scmp.ne.s32.totalorder %s1469_s9, %s1244_s20  ;;  %p1248_p4 = scmp.lt.u32.totalorder %s1244_s20, %s1469_s9 }
 0x3bd   :  { %p1250_p5 = pnand %p1248_p4, %p1245_p3 }
 0x3bf   :  { %1253 = shalt.err (!%p1250_p5)
}
 0x3c0   :  { %771 = dma.vmem_to_hbm [thread:$0]  %s766_s8, 256, %s1469_s9, [#allocation4], %s1264_s21, %s1264_s21, %s1265_s22  }
 0x3c1   :  { %1260 = dma.done.wait [#allocation4], 256  }
 0x3c2   :  { %1261 = vsyncadd [#allocation4], 4294967040 }
 0x3c3   :  { %775 = vsyncpa [#allocation3], 1 }
 0x3c4   :  { %776 = vsyncpa [#allocation6], 1 }
 0x3c5   :  { %777 = vsyncpa [#allocation9], 1 }
 0x3c6   :  { %778 = vsyncpa [#allocation4], 1 }

</bundles_post_ra>
